<compile_context>
chip_gen: v7x
topology: tpu7x:2x2x1
jax: 0.10.0
libtpu: 0.0.40
codegen_flags: <defaults>
</compile_context>

<pallas_src>
import functools
import numpy as np
import jax
import jax.numpy as jnp
from jax import lax
from jax.experimental import pallas as pl
from jax.experimental.pallas import tpu as pltpu

_LANE = 128
_SUBLANE = 8
_LOG_WEIGHT = float(np.log(1.0 / 3.0 + 1e-10))  # log of the equal mixture weight
_GATHER_UNROLL = 8   # rows per unrolled in-VMEM gather step
_DMA_UNROLL = 4      # rows per unrolled HBM DMA-issue step


def _round_up(x, m):
    return (x + m - 1) // m * m


def _vmem_capacity_bytes():
    """Generation-aware VMEM capacity (v5e/v6e: 128 MiB, v7x: 64 MiB/TC)."""
    try:
        info = pltpu.get_tpu_info()
        for attr in ("vmem_capacity_bytes", "vmem_size_bytes", "vmem_bytes"):
            v = getattr(info, attr, None)
            if v:
                return int(v)
    except Exception:
        pass
    return 64 * 1024 * 1024  # conservative default = v7x per-core ceiling


# ----------------------------------------------------------------------------
# Kernel A: all three tables VMEM-resident; in-VMEM row gather + fused combine
# ----------------------------------------------------------------------------
def _ngram_resident_kernel(bi_rows, tri_rows, four_rows,       # SMEM (prefetch)
                           bi_tab, tri_tab, four_tab,          # VMEM-resident tables
                           out_ref,                            # (TILE_BT, Vp)
                           bi_buf, tri_buf, four_buf):         # VMEM gather scratch
    tile_bt = out_ref.shape[0]
    base = pl.program_id(0) * tile_bt

    # Partially-unrolled in-VMEM row gather (no HBM DMAs at all on this path).
    def gather(u, carry):
        r0 = pl.multiple_of(u * _GATHER_UNROLL, _GATHER_UNROLL)
        for du in range(_GATHER_UNROLL):
            r = r0 + du
            g = base + r
            bi_buf[r, :] = bi_tab[bi_rows[g], :]
            tri_buf[r, :] = tri_tab[tri_rows[g], :]
            four_buf[r, :] = four_tab[four_rows[g], :]
        return carry
    lax.fori_loop(0, tile_bt // _GATHER_UNROLL, gather, 0)

    # Fully-vectorized weighted logsumexp over the 3 equally-weighted tables
    # (constant log-weight factored out).  Kept in f32 on all generations.
    bi = bi_buf[...]
    tri = tri_buf[...]
    four = four_buf[...]
    m = jnp.maximum(jnp.maximum(bi, tri), four)
    s = jnp.exp(bi - m) + jnp.exp(tri - m) + jnp.exp(four - m)
    out_ref[...] = m + (_LOG_WEIGHT + jnp.log(s))


# ----------------------------------------------------------------------------
# Kernel B: bigram/trigram VMEM-resident, fourgram rows gathered from HBM with
#           a double-buffered sub-chunk pipeline (all state within one step).
# ----------------------------------------------------------------------------
def _ngram_hbm_fourgram_kernel(n_sub, sub,
                               bi_rows, tri_rows, four_rows,   # SMEM (prefetch)
                               bi_tab, tri_tab,                # VMEM-resident
                               four_hbm,                       # HBM (pl.ANY)
                               out_ref,                        # (TILE_BT, Vp)
                               bi_buf, tri_buf,                # (sub, Vp)
                               four_buf,                       # (2, sub, Vp)
                               sems):                          # DMA sems, one per slot
    tile_bt = out_ref.shape[0]
    tile_base = pl.program_id(0) * tile_bt

    def issue(chunk, slot):
        cbase = tile_base + chunk * sub
        def body(u, carry):
            r0 = pl.multiple_of(u * _DMA_UNROLL, _DMA_UNROLL)
            for du in range(_DMA_UNROLL):
                r = r0 + du
                pltpu.make_async_copy(four_hbm.at[four_rows[cbase + r]],
                                      four_buf.at[slot, r],
                                      sems.at[slot]).start()
            return carry
        lax.fori_loop(0, sub // _DMA_UNROLL, body, 0)

    issue(0, 0)                        # prime slot 0 (no cross-grid-step state)
    for c in range(n_sub):             # static sub-chunk loop, double-buffered
        slot = c & 1
        # Wait for this chunk's fourgram rows; per-slot semaphore whose
        # accumulated byte count equals exactly one (sub, Vp) buffer.
        pltpu.make_async_copy(four_buf.at[slot], four_buf.at[slot],
                              sems.at[slot]).wait()
        if c + 1 < n_sub:              # next chunk's HBM gather overlaps this
            issue(c + 1, 1 - slot)     # chunk's VMEM gather + combine
        cbase = tile_base + c * sub

        def gather(u, carry, cbase=cbase):
            r0 = pl.multiple_of(u * _GATHER_UNROLL, _GATHER_UNROLL)
            for du in range(_GATHER_UNROLL):
                r = r0 + du
                g = cbase + r
                bi_buf[r, :] = bi_tab[bi_rows[g], :]
                tri_buf[r, :] = tri_tab[tri_rows[g], :]
            return carry
        lax.fori_loop(0, sub // _GATHER_UNROLL, gather, 0)

        bi = bi_buf[...]
        tri = tri_buf[...]
        four = four_buf[slot]
        m = jnp.maximum(jnp.maximum(bi, tri), four)
        s = jnp.exp(bi - m) + jnp.exp(tri - m) + jnp.exp(four - m)
        out_ref[pl.ds(c * sub, sub), :] = m + (_LOG_WEIGHT + jnp.log(s))


# ----------------------------------------------------------------------------
# Wrapper: index prep, table padding, tiling, residency decision
# ----------------------------------------------------------------------------
@functools.partial(jax.jit, static_argnames=("tile_bt",))
def ngram_forward(idx, bigram_lp, trigram_lp, fourgram_lp, *, tile_bt=512):
    """idx: (B, T) int token ids.  Tables: (V,V), (V,V,V), (V,V,V,V) float32
    log-probs.  Returns combined logits: (B, T, V) float32."""
    B, T = idx.shape
    V = bigram_lp.shape[-1]
    assert V ** 3 + 1 < 2 ** 31, "flattened fourgram row index overflows int32"

    Vp = _round_up(V, _LANE)                       # lane-dense vocab dim
    BT = B * T

    # Tile of the flattened B*T axis: multiple of 8, capped at ceil(BT/2) so a
    # "parallel" grid always has >= 2 tiles (v7x second TensorCore gets work).
    TILE_BT = max(_SUBLANE, _round_up(min(tile_bt, pl.cdiv(BT, 2)), _SUBLANE))
    if TILE_BT % 32 == 0:
        n_sub = 4
    elif TILE_BT % 16 == 0:
        n_sub = 2
    else:
        n_sub = 1
    sub = TILE_BT // n_sub
    BT_pad = _round_up(BT, TILE_BT)
    num_tiles = BT_pad // TILE_BT

    # Tables: flatten contexts, pad vocab to Vp lanes, append an all-zero row
    # at index `rows` ("uniform logits" for early timesteps / padded tokens);
    # first dim padded to a multiple of 8 for clean sublane layout.
    def prep(table, rows):
        t = table.reshape(rows, V).astype(jnp.float32)
        rows_p = _round_up(rows + 1, _SUBLANE)
        return jnp.pad(t, ((0, rows_p - rows), (0, Vp - V)))
    bi_tab = prep(bigram_lp, V)
    tri_tab = prep(trigram_lp, V * V)
    four_tab = prep(fourgram_lp, V ** 3)

    # Flattened context -> table-row indices, masked to the zero row.
    idx32 = idx.astype(jnp.int32)
    t_range = jnp.arange(T, dtype=jnp.int32)[None, :]
    prev1 = jnp.where(t_range >= 1, jnp.roll(idx32, 1, axis=1), 0)
    prev2 = jnp.where(t_range >= 2, jnp.roll(idx32, 2, axis=1), 0)
    prev3 = jnp.where(t_range >= 3, jnp.roll(idx32, 3, axis=1), 0)
    bi_rows = jnp.where(t_range >= 1, prev1, V)
    tri_rows = jnp.where(t_range >= 2, prev2 * V + prev1, V * V)
    four_rows = jnp.where(t_range >= 3, (prev3 * V + prev2) * V + prev1, V ** 3)

    def pad_rows(r, fill):
        return jnp.pad(r.reshape(BT), (0, BT_pad - BT),
                       constant_values=fill).astype(jnp.int32)
    bi_rows = pad_rows(bi_rows, V)
    tri_rows = pad_rows(tri_rows, V * V)
    four_rows = pad_rows(four_rows, V ** 3)

    # Generation-aware VMEM budgeting (resident tables budgeted 2x since the
    # pipeline may double-buffer inputs even with a constant index_map).
    blk = TILE_BT * Vp * 4
    bi_b = bi_tab.shape[0] * Vp * 4
    tri_b = tri_tab.shape[0] * Vp * 4
    four_b = four_tab.shape[0] * Vp * 4
    cap = _vmem_capacity_bytes()
    resident_foot = 2 * (bi_b + tri_b + four_b) + 2 * blk + 3 * blk
    fourgram_resident = resident_foot <= int(0.72 * cap)

    if fourgram_resident:
        foot = resident_foot
        kernel = _ngram_resident_kernel
        table_in_specs = [
            pl.BlockSpec(bi_tab.shape, lambda i, *_: (0, 0)),
            pl.BlockSpec(tri_tab.shape, lambda i, *_: (0, 0)),
            pl.BlockSpec(four_tab.shape, lambda i, *_: (0, 0)),
        ]
        scratch = [pltpu.VMEM((TILE_BT, Vp), jnp.float32)] * 3
        gather_hbm_bytes = 0
    else:
        foot = 2 * (bi_b + tri_b) + 2 * blk + 4 * (sub * Vp * 4)
        kernel = functools.partial(_ngram_hbm_fourgram_kernel, n_sub, sub)
        table_in_specs = [
            pl.BlockSpec(bi_tab.shape, lambda i, *_: (0, 0)),
            pl.BlockSpec(tri_tab.shape, lambda i, *_: (0, 0)),
            pl.BlockSpec(memory_space=pl.ANY),        # fourgram stays in HBM
        ]
        scratch = [pltpu.VMEM((sub, Vp), jnp.float32),
                   pltpu.VMEM((sub, Vp), jnp.float32),
                   pltpu.VMEM((2, sub, Vp), jnp.float32),
                   pltpu.SemaphoreType.DMA((2,))]
        gather_hbm_bytes = BT_pad * Vp * 4

    vmem_limit = min(int(foot * 1.5) + (8 << 20), cap - (4 << 20))

    grid_spec = pltpu.PrefetchScalarGridSpec(
        num_scalar_prefetch=3,
        grid=(num_tiles,),
        in_specs=table_in_specs,
        out_specs=pl.BlockSpec((TILE_BT, Vp), lambda i, *_: (i, 0)),
        scratch_shapes=scratch,
    )

    cost = pl.CostEstimate(
        flops=8 * BT_pad * Vp,
        transcendentals=4 * BT_pad * Vp,                 # 3 exp + 1 log / element
        bytes_accessed=(bi_b + tri_b + four_b) + BT_pad * Vp * 4
                       + gather_hbm_bytes + 3 * BT_pad * 4,
    )

    out = pl.pallas_call(
        kernel,
        out_shape=jax.ShapeDtypeStruct((BT_pad, Vp), jnp.float32),
        grid_spec=grid_spec,
        compiler_params=pltpu.CompilerParams(
            dimension_semantics=("parallel",),           # megacore split on v7x
            vmem_limit_bytes=vmem_limit),
        cost_estimate=cost,
    )(bi_rows, tri_rows, four_rows, bi_tab, tri_tab, four_tab)

    if BT_pad == BT and Vp == V:
        return out.reshape(B, T, V)   # skip the extra HBM slice pass when dense
    return out[:BT, :V].reshape(B, T, V)


# ----------------------------------------------------------------------------
# Deterministic "module __init__" setup (synthetic n-gram statistics)
# ----------------------------------------------------------------------------
def build_ngram_tables(vocab_size, smoothing=1.0, text_len=300, seed=0):
    rng = np.random.RandomState(seed)
    text_indices = rng.randint(0, vocab_size, size=text_len)

    V = vocab_size
    bigram = np.full((V, V), smoothing, dtype=np.float64)
    trigram = np.full((V, V, V), smoothing, dtype=np.float64)
    fourgram = np.full((V, V, V, V), smoothing, dtype=np.float64)
    for i in range(len(text_indices) - 1):
        bigram[text_indices[i], text_indices[i + 1]] += 1
    for i in range(len(text_indices) - 2):
        trigram[text_indices[i], text_indices[i + 1], text_indices[i + 2]] += 1
    for i in range(len(text_indices) - 3):
        fourgram[text_indices[i], text_indices[i + 1],
                 text_indices[i + 2], text_indices[i + 3]] += 1

    def log_probs(counts):
        probs = counts / counts.sum(axis=-1, keepdims=True)
        return np.clip(np.log(probs + 1e-08), -20.0, None).astype(np.float32)

    return log_probs(bigram), log_probs(trigram), log_probs(fourgram)


# ----------------------------------------------------------------------------
# Pure-numpy reference matching the PyTorch forward
# ----------------------------------------------------------------------------
def reference_forward(idx, bi_lp, tri_lp, four_lp, V):
    B, T = idx.shape
    bi = np.zeros((B, T, V), np.float32)
    tri = np.zeros((B, T, V), np.float32)
    four = np.zeros((B, T, V), np.float32)
    for t in range(T):
        if t >= 1:
            bi[:, t, :] = bi_lp[idx[:, t - 1]]
        if t >= 2:
            tri[:, t, :] = tri_lp[idx[:, t - 2], idx[:, t - 1]]
        if t >= 3:
            four[:, t, :] = four_lp[idx[:, t - 3], idx[:, t - 2], idx[:, t - 1]]
    lw = np.log(np.float32(1.0 / 3.0) + np.float32(1e-10))
    stacked = np.stack([bi, tri, four], axis=0) + lw
    m = stacked.max(axis=0)
    return m + np.log(np.exp(stacked - m).sum(axis=0))


if __name__ == "__main__":
    B, T, V = 2, 8, 16

    bi_lp, tri_lp, four_lp = build_ngram_tables(V, smoothing=1.0, seed=0)

    idx = jax.random.randint(jax.random.PRNGKey(0), (B, T), 0, V, dtype=jnp.int32)

    out = ngram_forward(idx,
                        jnp.asarray(bi_lp),
                        jnp.asarray(tri_lp),
                        jnp.asarray(four_lp))
    out = jax.block_until_ready(out)

    ref = reference_forward(np.asarray(idx), bi_lp, tri_lp, four_lp, V)
    np.testing.assert_allclose(np.asarray(out), ref, rtol=2e-3, atol=2e-3)

    print("KERNEL_OK")
</pallas_src>

<mosaic_0001>
module attributes {stable_mosaic.version = 11 : i64} {
  func.func @_ngram_resident_kernel(%arg0: i32, %arg1: memref<16xi32, #tpu.memory_space<smem>>, %arg2: memref<16xi32, #tpu.memory_space<smem>>, %arg3: memref<16xi32, #tpu.memory_space<smem>>, %arg4: memref<24x128xf32, #tpu.memory_space<vmem>>, %arg5: memref<264x128xf32, #tpu.memory_space<vmem>>, %arg6: memref<4104x128xf32, #tpu.memory_space<vmem>>, %arg7: memref<8x128xf32, #tpu.memory_space<vmem>>, %arg8: memref<8x128xf32, #tpu.memory_space<vmem>>, %arg9: memref<8x128xf32, #tpu.memory_space<vmem>>, %arg10: memref<8x128xf32, #tpu.memory_space<vmem>>) attributes {dimension_semantics = [#tpu.dimension_semantics<parallel>], iteration_bounds = array<i64: 2>, scalar_prefetch = 3 : i64, scratch_operands = 3 : i64, tpu.core_type = #tpu.core_type<tc>, window_params = [{pipeline_mode = #tpu.pipeline_mode<synchronous>, transform_indices = @transform_0, window_bounds = array<i64: 24, 128>}, {pipeline_mode = #tpu.pipeline_mode<synchronous>, transform_indices = @transform_1, window_bounds = array<i64: 264, 128>}, {pipeline_mode = #tpu.pipeline_mode<synchronous>, transform_indices = @transform_2, window_bounds = array<i64: 4104, 128>}, {transform_indices = @transform_3, window_bounds = array<i64: 8, 128>}]} {
    %c8_i32 = arith.constant 8 : i32
    %0 = arith.muli %arg0, %c8_i32 : i32
    %c0_i32 = arith.constant 0 : i32
    %c8_i32_0 = arith.constant 8 : i32
    %1 = arith.muli %c0_i32, %c8_i32_0 : i32
    %2 = tpu.assume_multiple %1, 8 : i32
    %c0_i32_1 = arith.constant 0 : i32
    %3 = arith.addi %2, %c0_i32_1 : i32
    %4 = arith.addi %0, %3 : i32
    %5 = arith.index_cast %4 : i32 to index
    %6 = memref.load %arg1[%5] : memref<16xi32, #tpu.memory_space<smem>>
    %7 = arith.index_cast %6 : i32 to index
    %c0 = arith.constant 0 : index
    %8 = vector.load %arg4[%7, %c0] : memref<24x128xf32, #tpu.memory_space<vmem>>, vector<1x128xf32>
    %9 = vector.shape_cast %8 : vector<1x128xf32> to vector<128xf32>
    %10 = arith.index_cast %3 : i32 to index
    %c0_2 = arith.constant 0 : index
    %11 = vector.load %arg8[%10, %c0_2] : memref<8x128xf32, #tpu.memory_space<vmem>>, vector<1x128xf32>
    %12 = vector.shape_cast %11 : vector<1x128xf32> to vector<128xf32>
    %13 = vector.shape_cast %9 : vector<128xf32> to vector<1x128xf32>
    tpu.vector_store %arg8[%10, %c0_2], %13 {strides = array<i32>} : memref<8x128xf32, #tpu.memory_space<vmem>>, vector<1x128xf32>,
    %14 = arith.index_cast %4 : i32 to index
    %15 = memref.load %arg2[%14] : memref<16xi32, #tpu.memory_space<smem>>
    %16 = arith.index_cast %15 : i32 to index
    %c0_3 = arith.constant 0 : index
    %17 = vector.load %arg5[%16, %c0_3] : memref<264x128xf32, #tpu.memory_space<vmem>>, vector<1x128xf32>
    %18 = vector.shape_cast %17 : vector<1x128xf32> to vector<128xf32>
    %19 = arith.index_cast %3 : i32 to index
    %c0_4 = arith.constant 0 : index
    %20 = vector.load %arg9[%19, %c0_4] : memref<8x128xf32, #tpu.memory_space<vmem>>, vector<1x128xf32>
    %21 = vector.shape_cast %20 : vector<1x128xf32> to vector<128xf32>
    %22 = vector.shape_cast %18 : vector<128xf32> to vector<1x128xf32>
    tpu.vector_store %arg9[%19, %c0_4], %22 {strides = array<i32>} : memref<8x128xf32, #tpu.memory_space<vmem>>, vector<1x128xf32>,
    %23 = arith.index_cast %4 : i32 to index
    %24 = memref.load %arg3[%23] : memref<16xi32, #tpu.memory_space<smem>>
    %25 = arith.index_cast %24 : i32 to index
    %c0_5 = arith.constant 0 : index
    %26 = vector.load %arg6[%25, %c0_5] : memref<4104x128xf32, #tpu.memory_space<vmem>>, vector<1x128xf32>
    %27 = vector.shape_cast %26 : vector<1x128xf32> to vector<128xf32>
    %28 = arith.index_cast %3 : i32 to index
    %c0_6 = arith.constant 0 : index
    %29 = vector.load %arg10[%28, %c0_6] : memref<8x128xf32, #tpu.memory_space<vmem>>, vector<1x128xf32>
    %30 = vector.shape_cast %29 : vector<1x128xf32> to vector<128xf32>
    %31 = vector.shape_cast %27 : vector<128xf32> to vector<1x128xf32>
    tpu.vector_store %arg10[%28, %c0_6], %31 {strides = array<i32>} : memref<8x128xf32, #tpu.memory_space<vmem>>, vector<1x128xf32>,
    %c1_i32 = arith.constant 1 : i32
    %32 = arith.addi %2, %c1_i32 : i32
    %33 = arith.addi %0, %32 : i32
    %34 = arith.index_cast %33 : i32 to index
    %35 = memref.load %arg1[%34] : memref<16xi32, #tpu.memory_space<smem>>
    %36 = arith.index_cast %35 : i32 to index
    %c0_7 = arith.constant 0 : index
    %37 = vector.load %arg4[%36, %c0_7] : memref<24x128xf32, #tpu.memory_space<vmem>>, vector<1x128xf32>
    %38 = vector.shape_cast %37 : vector<1x128xf32> to vector<128xf32>
    %39 = arith.index_cast %32 : i32 to index
    %c0_8 = arith.constant 0 : index
    %40 = vector.load %arg8[%39, %c0_8] : memref<8x128xf32, #tpu.memory_space<vmem>>, vector<1x128xf32>
    %41 = vector.shape_cast %40 : vector<1x128xf32> to vector<128xf32>
    %42 = vector.shape_cast %38 : vector<128xf32> to vector<1x128xf32>
    tpu.vector_store %arg8[%39, %c0_8], %42 {strides = array<i32>} : memref<8x128xf32, #tpu.memory_space<vmem>>, vector<1x128xf32>,
    %43 = arith.index_cast %33 : i32 to index
    %44 = memref.load %arg2[%43] : memref<16xi32, #tpu.memory_space<smem>>
    %45 = arith.index_cast %44 : i32 to index
    %c0_9 = arith.constant 0 : index
    %46 = vector.load %arg5[%45, %c0_9] : memref<264x128xf32, #tpu.memory_space<vmem>>, vector<1x128xf32>
    %47 = vector.shape_cast %46 : vector<1x128xf32> to vector<128xf32>
    %48 = arith.index_cast %32 : i32 to index
    %c0_10 = arith.constant 0 : index
    %49 = vector.load %arg9[%48, %c0_10] : memref<8x128xf32, #tpu.memory_space<vmem>>, vector<1x128xf32>
    %50 = vector.shape_cast %49 : vector<1x128xf32> to vector<128xf32>
    %51 = vector.shape_cast %47 : vector<128xf32> to vector<1x128xf32>
    tpu.vector_store %arg9[%48, %c0_10], %51 {strides = array<i32>} : memref<8x128xf32, #tpu.memory_space<vmem>>, vector<1x128xf32>,
    %52 = arith.index_cast %33 : i32 to index
    %53 = memref.load %arg3[%52] : memref<16xi32, #tpu.memory_space<smem>>
    %54 = arith.index_cast %53 : i32 to index
    %c0_11 = arith.constant 0 : index
    %55 = vector.load %arg6[%54, %c0_11] : memref<4104x128xf32, #tpu.memory_space<vmem>>, vector<1x128xf32>
    %56 = vector.shape_cast %55 : vector<1x128xf32> to vector<128xf32>
    %57 = arith.index_cast %32 : i32 to index
    %c0_12 = arith.constant 0 : index
    %58 = vector.load %arg10[%57, %c0_12] : memref<8x128xf32, #tpu.memory_space<vmem>>, vector<1x128xf32>
    %59 = vector.shape_cast %58 : vector<1x128xf32> to vector<128xf32>
    %60 = vector.shape_cast %56 : vector<128xf32> to vector<1x128xf32>
    tpu.vector_store %arg10[%57, %c0_12], %60 {strides = array<i32>} : memref<8x128xf32, #tpu.memory_space<vmem>>, vector<1x128xf32>,
    %c2_i32 = arith.constant 2 : i32
    %61 = arith.addi %2, %c2_i32 : i32
    %62 = arith.addi %0, %61 : i32
    %63 = arith.index_cast %62 : i32 to index
    %64 = memref.load %arg1[%63] : memref<16xi32, #tpu.memory_space<smem>>
    %65 = arith.index_cast %64 : i32 to index
    %c0_13 = arith.constant 0 : index
    %66 = vector.load %arg4[%65, %c0_13] : memref<24x128xf32, #tpu.memory_space<vmem>>, vector<1x128xf32>
    %67 = vector.shape_cast %66 : vector<1x128xf32> to vector<128xf32>
    %68 = arith.index_cast %61 : i32 to index
    %c0_14 = arith.constant 0 : index
    %69 = vector.load %arg8[%68, %c0_14] : memref<8x128xf32, #tpu.memory_space<vmem>>, vector<1x128xf32>
    %70 = vector.shape_cast %69 : vector<1x128xf32> to vector<128xf32>
    %71 = vector.shape_cast %67 : vector<128xf32> to vector<1x128xf32>
    tpu.vector_store %arg8[%68, %c0_14], %71 {strides = array<i32>} : memref<8x128xf32, #tpu.memory_space<vmem>>, vector<1x128xf32>,
    %72 = arith.index_cast %62 : i32 to index
    %73 = memref.load %arg2[%72] : memref<16xi32, #tpu.memory_space<smem>>
    %74 = arith.index_cast %73 : i32 to index
    %c0_15 = arith.constant 0 : index
    %75 = vector.load %arg5[%74, %c0_15] : memref<264x128xf32, #tpu.memory_space<vmem>>, vector<1x128xf32>
    %76 = vector.shape_cast %75 : vector<1x128xf32> to vector<128xf32>
    %77 = arith.index_cast %61 : i32 to index
    %c0_16 = arith.constant 0 : index
    %78 = vector.load %arg9[%77, %c0_16] : memref<8x128xf32, #tpu.memory_space<vmem>>, vector<1x128xf32>
    %79 = vector.shape_cast %78 : vector<1x128xf32> to vector<128xf32>
    %80 = vector.shape_cast %76 : vector<128xf32> to vector<1x128xf32>
    tpu.vector_store %arg9[%77, %c0_16], %80 {strides = array<i32>} : memref<8x128xf32, #tpu.memory_space<vmem>>, vector<1x128xf32>,
    %81 = arith.index_cast %62 : i32 to index
    %82 = memref.load %arg3[%81] : memref<16xi32, #tpu.memory_space<smem>>
    %83 = arith.index_cast %82 : i32 to index
    %c0_17 = arith.constant 0 : index
    %84 = vector.load %arg6[%83, %c0_17] : memref<4104x128xf32, #tpu.memory_space<vmem>>, vector<1x128xf32>
    %85 = vector.shape_cast %84 : vector<1x128xf32> to vector<128xf32>
    %86 = arith.index_cast %61 : i32 to index
    %c0_18 = arith.constant 0 : index
    %87 = vector.load %arg10[%86, %c0_18] : memref<8x128xf32, #tpu.memory_space<vmem>>, vector<1x128xf32>
    %88 = vector.shape_cast %87 : vector<1x128xf32> to vector<128xf32>
    %89 = vector.shape_cast %85 : vector<128xf32> to vector<1x128xf32>
    tpu.vector_store %arg10[%86, %c0_18], %89 {strides = array<i32>} : memref<8x128xf32, #tpu.memory_space<vmem>>, vector<1x128xf32>,
    %c3_i32 = arith.constant 3 : i32
    %90 = arith.addi %2, %c3_i32 : i32
    %91 = arith.addi %0, %90 : i32
    %92 = arith.index_cast %91 : i32 to index
    %93 = memref.load %arg1[%92] : memref<16xi32, #tpu.memory_space<smem>>
    %94 = arith.index_cast %93 : i32 to index
    %c0_19 = arith.constant 0 : index
    %95 = vector.load %arg4[%94, %c0_19] : memref<24x128xf32, #tpu.memory_space<vmem>>, vector<1x128xf32>
    %96 = vector.shape_cast %95 : vector<1x128xf32> to vector<128xf32>
    %97 = arith.index_cast %90 : i32 to index
    %c0_20 = arith.constant 0 : index
    %98 = vector.load %arg8[%97, %c0_20] : memref<8x128xf32, #tpu.memory_space<vmem>>, vector<1x128xf32>
    %99 = vector.shape_cast %98 : vector<1x128xf32> to vector<128xf32>
    %100 = vector.shape_cast %96 : vector<128xf32> to vector<1x128xf32>
    tpu.vector_store %arg8[%97, %c0_20], %100 {strides = array<i32>} : memref<8x128xf32, #tpu.memory_space<vmem>>, vector<1x128xf32>,
    %101 = arith.index_cast %91 : i32 to index
    %102 = memref.load %arg2[%101] : memref<16xi32, #tpu.memory_space<smem>>
    %103 = arith.index_cast %102 : i32 to index
    %c0_21 = arith.constant 0 : index
    %104 = vector.load %arg5[%103, %c0_21] : memref<264x128xf32, #tpu.memory_space<vmem>>, vector<1x128xf32>
    %105 = vector.shape_cast %104 : vector<1x128xf32> to vector<128xf32>
    %106 = arith.index_cast %90 : i32 to index
    %c0_22 = arith.constant 0 : index
    %107 = vector.load %arg9[%106, %c0_22] : memref<8x128xf32, #tpu.memory_space<vmem>>, vector<1x128xf32>
    %108 = vector.shape_cast %107 : vector<1x128xf32> to vector<128xf32>
    %109 = vector.shape_cast %105 : vector<128xf32> to vector<1x128xf32>
    tpu.vector_store %arg9[%106, %c0_22], %109 {strides = array<i32>} : memref<8x128xf32, #tpu.memory_space<vmem>>, vector<1x128xf32>,
    %110 = arith.index_cast %91 : i32 to index
    %111 = memref.load %arg3[%110] : memref<16xi32, #tpu.memory_space<smem>>
    %112 = arith.index_cast %111 : i32 to index
    %c0_23 = arith.constant 0 : index
    %113 = vector.load %arg6[%112, %c0_23] : memref<4104x128xf32, #tpu.memory_space<vmem>>, vector<1x128xf32>
    %114 = vector.shape_cast %113 : vector<1x128xf32> to vector<128xf32>
    %115 = arith.index_cast %90 : i32 to index
    %c0_24 = arith.constant 0 : index
    %116 = vector.load %arg10[%115, %c0_24] : memref<8x128xf32, #tpu.memory_space<vmem>>, vector<1x128xf32>
    %117 = vector.shape_cast %116 : vector<1x128xf32> to vector<128xf32>
    %118 = vector.shape_cast %114 : vector<128xf32> to vector<1x128xf32>
    tpu.vector_store %arg10[%115, %c0_24], %118 {strides = array<i32>} : memref<8x128xf32, #tpu.memory_space<vmem>>, vector<1x128xf32>,
    %c4_i32 = arith.constant 4 : i32
    %119 = arith.addi %2, %c4_i32 : i32
    %120 = arith.addi %0, %119 : i32
    %121 = arith.index_cast %120 : i32 to index
    %122 = memref.load %arg1[%121] : memref<16xi32, #tpu.memory_space<smem>>
    %123 = arith.index_cast %122 : i32 to index
    %c0_25 = arith.constant 0 : index
    %124 = vector.load %arg4[%123, %c0_25] : memref<24x128xf32, #tpu.memory_space<vmem>>, vector<1x128xf32>
    %125 = vector.shape_cast %124 : vector<1x128xf32> to vector<128xf32>
    %126 = arith.index_cast %119 : i32 to index
    %c0_26 = arith.constant 0 : index
    %127 = vector.load %arg8[%126, %c0_26] : memref<8x128xf32, #tpu.memory_space<vmem>>, vector<1x128xf32>
    %128 = vector.shape_cast %127 : vector<1x128xf32> to vector<128xf32>
    %129 = vector.shape_cast %125 : vector<128xf32> to vector<1x128xf32>
    tpu.vector_store %arg8[%126, %c0_26], %129 {strides = array<i32>} : memref<8x128xf32, #tpu.memory_space<vmem>>, vector<1x128xf32>,
    %130 = arith.index_cast %120 : i32 to index
    %131 = memref.load %arg2[%130] : memref<16xi32, #tpu.memory_space<smem>>
    %132 = arith.index_cast %131 : i32 to index
    %c0_27 = arith.constant 0 : index
    %133 = vector.load %arg5[%132, %c0_27] : memref<264x128xf32, #tpu.memory_space<vmem>>, vector<1x128xf32>
    %134 = vector.shape_cast %133 : vector<1x128xf32> to vector<128xf32>
    %135 = arith.index_cast %119 : i32 to index
    %c0_28 = arith.constant 0 : index
    %136 = vector.load %arg9[%135, %c0_28] : memref<8x128xf32, #tpu.memory_space<vmem>>, vector<1x128xf32>
    %137 = vector.shape_cast %136 : vector<1x128xf32> to vector<128xf32>
    %138 = vector.shape_cast %134 : vector<128xf32> to vector<1x128xf32>
    tpu.vector_store %arg9[%135, %c0_28], %138 {strides = array<i32>} : memref<8x128xf32, #tpu.memory_space<vmem>>, vector<1x128xf32>,
    %139 = arith.index_cast %120 : i32 to index
    %140 = memref.load %arg3[%139] : memref<16xi32, #tpu.memory_space<smem>>
    %141 = arith.index_cast %140 : i32 to index
    %c0_29 = arith.constant 0 : index
    %142 = vector.load %arg6[%141, %c0_29] : memref<4104x128xf32, #tpu.memory_space<vmem>>, vector<1x128xf32>
    %143 = vector.shape_cast %142 : vector<1x128xf32> to vector<128xf32>
    %144 = arith.index_cast %119 : i32 to index
    %c0_30 = arith.constant 0 : index
    %145 = vector.load %arg10[%144, %c0_30] : memref<8x128xf32, #tpu.memory_space<vmem>>, vector<1x128xf32>
    %146 = vector.shape_cast %145 : vector<1x128xf32> to vector<128xf32>
    %147 = vector.shape_cast %143 : vector<128xf32> to vector<1x128xf32>
    tpu.vector_store %arg10[%144, %c0_30], %147 {strides = array<i32>} : memref<8x128xf32, #tpu.memory_space<vmem>>, vector<1x128xf32>,
    %c5_i32 = arith.constant 5 : i32
    %148 = arith.addi %2, %c5_i32 : i32
    %149 = arith.addi %0, %148 : i32
    %150 = arith.index_cast %149 : i32 to index
    %151 = memref.load %arg1[%150] : memref<16xi32, #tpu.memory_space<smem>>
    %152 = arith.index_cast %151 : i32 to index
    %c0_31 = arith.constant 0 : index
    %153 = vector.load %arg4[%152, %c0_31] : memref<24x128xf32, #tpu.memory_space<vmem>>, vector<1x128xf32>
    %154 = vector.shape_cast %153 : vector<1x128xf32> to vector<128xf32>
    %155 = arith.index_cast %148 : i32 to index
    %c0_32 = arith.constant 0 : index
    %156 = vector.load %arg8[%155, %c0_32] : memref<8x128xf32, #tpu.memory_space<vmem>>, vector<1x128xf32>
    %157 = vector.shape_cast %156 : vector<1x128xf32> to vector<128xf32>
    %158 = vector.shape_cast %154 : vector<128xf32> to vector<1x128xf32>
    tpu.vector_store %arg8[%155, %c0_32], %158 {strides = array<i32>} : memref<8x128xf32, #tpu.memory_space<vmem>>, vector<1x128xf32>,
    %159 = arith.index_cast %149 : i32 to index
    %160 = memref.load %arg2[%159] : memref<16xi32, #tpu.memory_space<smem>>
    %161 = arith.index_cast %160 : i32 to index
    %c0_33 = arith.constant 0 : index
    %162 = vector.load %arg5[%161, %c0_33] : memref<264x128xf32, #tpu.memory_space<vmem>>, vector<1x128xf32>
    %163 = vector.shape_cast %162 : vector<1x128xf32> to vector<128xf32>
    %164 = arith.index_cast %148 : i32 to index
    %c0_34 = arith.constant 0 : index
    %165 = vector.load %arg9[%164, %c0_34] : memref<8x128xf32, #tpu.memory_space<vmem>>, vector<1x128xf32>
    %166 = vector.shape_cast %165 : vector<1x128xf32> to vector<128xf32>
    %167 = vector.shape_cast %163 : vector<128xf32> to vector<1x128xf32>
    tpu.vector_store %arg9[%164, %c0_34], %167 {strides = array<i32>} : memref<8x128xf32, #tpu.memory_space<vmem>>, vector<1x128xf32>,
    %168 = arith.index_cast %149 : i32 to index
    %169 = memref.load %arg3[%168] : memref<16xi32, #tpu.memory_space<smem>>
    %170 = arith.index_cast %169 : i32 to index
    %c0_35 = arith.constant 0 : index
    %171 = vector.load %arg6[%170, %c0_35] : memref<4104x128xf32, #tpu.memory_space<vmem>>, vector<1x128xf32>
    %172 = vector.shape_cast %171 : vector<1x128xf32> to vector<128xf32>
    %173 = arith.index_cast %148 : i32 to index
    %c0_36 = arith.constant 0 : index
    %174 = vector.load %arg10[%173, %c0_36] : memref<8x128xf32, #tpu.memory_space<vmem>>, vector<1x128xf32>
    %175 = vector.shape_cast %174 : vector<1x128xf32> to vector<128xf32>
    %176 = vector.shape_cast %172 : vector<128xf32> to vector<1x128xf32>
    tpu.vector_store %arg10[%173, %c0_36], %176 {strides = array<i32>} : memref<8x128xf32, #tpu.memory_space<vmem>>, vector<1x128xf32>,
    %c6_i32 = arith.constant 6 : i32
    %177 = arith.addi %2, %c6_i32 : i32
    %178 = arith.addi %0, %177 : i32
    %179 = arith.index_cast %178 : i32 to index
    %180 = memref.load %arg1[%179] : memref<16xi32, #tpu.memory_space<smem>>
    %181 = arith.index_cast %180 : i32 to index
    %c0_37 = arith.constant 0 : index
    %182 = vector.load %arg4[%181, %c0_37] : memref<24x128xf32, #tpu.memory_space<vmem>>, vector<1x128xf32>
    %183 = vector.shape_cast %182 : vector<1x128xf32> to vector<128xf32>
    %184 = arith.index_cast %177 : i32 to index
    %c0_38 = arith.constant 0 : index
    %185 = vector.load %arg8[%184, %c0_38] : memref<8x128xf32, #tpu.memory_space<vmem>>, vector<1x128xf32>
    %186 = vector.shape_cast %185 : vector<1x128xf32> to vector<128xf32>
    %187 = vector.shape_cast %183 : vector<128xf32> to vector<1x128xf32>
    tpu.vector_store %arg8[%184, %c0_38], %187 {strides = array<i32>} : memref<8x128xf32, #tpu.memory_space<vmem>>, vector<1x128xf32>,
    %188 = arith.index_cast %178 : i32 to index
    %189 = memref.load %arg2[%188] : memref<16xi32, #tpu.memory_space<smem>>
    %190 = arith.index_cast %189 : i32 to index
    %c0_39 = arith.constant 0 : index
    %191 = vector.load %arg5[%190, %c0_39] : memref<264x128xf32, #tpu.memory_space<vmem>>, vector<1x128xf32>
    %192 = vector.shape_cast %191 : vector<1x128xf32> to vector<128xf32>
    %193 = arith.index_cast %177 : i32 to index
    %c0_40 = arith.constant 0 : index
    %194 = vector.load %arg9[%193, %c0_40] : memref<8x128xf32, #tpu.memory_space<vmem>>, vector<1x128xf32>
    %195 = vector.shape_cast %194 : vector<1x128xf32> to vector<128xf32>
    %196 = vector.shape_cast %192 : vector<128xf32> to vector<1x128xf32>
    tpu.vector_store %arg9[%193, %c0_40], %196 {strides = array<i32>} : memref<8x128xf32, #tpu.memory_space<vmem>>, vector<1x128xf32>,
    %197 = arith.index_cast %178 : i32 to index
    %198 = memref.load %arg3[%197] : memref<16xi32, #tpu.memory_space<smem>>
    %199 = arith.index_cast %198 : i32 to index
    %c0_41 = arith.constant 0 : index
    %200 = vector.load %arg6[%199, %c0_41] : memref<4104x128xf32, #tpu.memory_space<vmem>>, vector<1x128xf32>
    %201 = vector.shape_cast %200 : vector<1x128xf32> to vector<128xf32>
    %202 = arith.index_cast %177 : i32 to index
    %c0_42 = arith.constant 0 : index
    %203 = vector.load %arg10[%202, %c0_42] : memref<8x128xf32, #tpu.memory_space<vmem>>, vector<1x128xf32>
    %204 = vector.shape_cast %203 : vector<1x128xf32> to vector<128xf32>
    %205 = vector.shape_cast %201 : vector<128xf32> to vector<1x128xf32>
    tpu.vector_store %arg10[%202, %c0_42], %205 {strides = array<i32>} : memref<8x128xf32, #tpu.memory_space<vmem>>, vector<1x128xf32>,
    %c7_i32 = arith.constant 7 : i32
    %206 = arith.addi %2, %c7_i32 : i32
    %207 = arith.addi %0, %206 : i32
    %208 = arith.index_cast %207 : i32 to index
    %209 = memref.load %arg1[%208] : memref<16xi32, #tpu.memory_space<smem>>
    %210 = arith.index_cast %209 : i32 to index
    %c0_43 = arith.constant 0 : index
    %211 = vector.load %arg4[%210, %c0_43] : memref<24x128xf32, #tpu.memory_space<vmem>>, vector<1x128xf32>
    %212 = vector.shape_cast %211 : vector<1x128xf32> to vector<128xf32>
    %213 = arith.index_cast %206 : i32 to index
    %c0_44 = arith.constant 0 : index
    %214 = vector.load %arg8[%213, %c0_44] : memref<8x128xf32, #tpu.memory_space<vmem>>, vector<1x128xf32>
    %215 = vector.shape_cast %214 : vector<1x128xf32> to vector<128xf32>
    %216 = vector.shape_cast %212 : vector<128xf32> to vector<1x128xf32>
    tpu.vector_store %arg8[%213, %c0_44], %216 {strides = array<i32>} : memref<8x128xf32, #tpu.memory_space<vmem>>, vector<1x128xf32>,
    %217 = arith.index_cast %207 : i32 to index
    %218 = memref.load %arg2[%217] : memref<16xi32, #tpu.memory_space<smem>>
    %219 = arith.index_cast %218 : i32 to index
    %c0_45 = arith.constant 0 : index
    %220 = vector.load %arg5[%219, %c0_45] : memref<264x128xf32, #tpu.memory_space<vmem>>, vector<1x128xf32>
    %221 = vector.shape_cast %220 : vector<1x128xf32> to vector<128xf32>
    %222 = arith.index_cast %206 : i32 to index
    %c0_46 = arith.constant 0 : index
    %223 = vector.load %arg9[%222, %c0_46] : memref<8x128xf32, #tpu.memory_space<vmem>>, vector<1x128xf32>
    %224 = vector.shape_cast %223 : vector<1x128xf32> to vector<128xf32>
    %225 = vector.shape_cast %221 : vector<128xf32> to vector<1x128xf32>
    tpu.vector_store %arg9[%222, %c0_46], %225 {strides = array<i32>} : memref<8x128xf32, #tpu.memory_space<vmem>>, vector<1x128xf32>,
    %226 = arith.index_cast %207 : i32 to index
    %227 = memref.load %arg3[%226] : memref<16xi32, #tpu.memory_space<smem>>
    %228 = arith.index_cast %227 : i32 to index
    %c0_47 = arith.constant 0 : index
    %229 = vector.load %arg6[%228, %c0_47] : memref<4104x128xf32, #tpu.memory_space<vmem>>, vector<1x128xf32>
    %230 = vector.shape_cast %229 : vector<1x128xf32> to vector<128xf32>
    %231 = arith.index_cast %206 : i32 to index
    %c0_48 = arith.constant 0 : index
    %232 = vector.load %arg10[%231, %c0_48] : memref<8x128xf32, #tpu.memory_space<vmem>>, vector<1x128xf32>
    %233 = vector.shape_cast %232 : vector<1x128xf32> to vector<128xf32>
    %234 = vector.shape_cast %230 : vector<128xf32> to vector<1x128xf32>
    tpu.vector_store %arg10[%231, %c0_48], %234 {strides = array<i32>} : memref<8x128xf32, #tpu.memory_space<vmem>>, vector<1x128xf32>,
    %c1_i32_49 = arith.constant 1 : i32
    %c0_50 = arith.constant 0 : index
    %c0_51 = arith.constant 0 : index
    %235 = vector.load %arg8[%c0_50, %c0_51] : memref<8x128xf32, #tpu.memory_space<vmem>>, vector<8x128xf32>
    %c0_52 = arith.constant 0 : index
    %c0_53 = arith.constant 0 : index
    %236 = vector.load %arg9[%c0_52, %c0_53] : memref<8x128xf32, #tpu.memory_space<vmem>>, vector<8x128xf32>
    %c0_54 = arith.constant 0 : index
    %c0_55 = arith.constant 0 : index
    %237 = vector.load %arg10[%c0_54, %c0_55] : memref<8x128xf32, #tpu.memory_space<vmem>>, vector<8x128xf32>
    %238 = arith.maximumf %235, %236 : vector<8x128xf32>
    %239 = arith.maximumf %238, %237 : vector<8x128xf32>
    %240 = arith.subf %235, %239 : vector<8x128xf32>
    %241 = math.exp %240 : vector<8x128xf32>
    %242 = arith.subf %236, %239 : vector<8x128xf32>
    %243 = math.exp %242 : vector<8x128xf32>
    %244 = arith.addf %241, %243 : vector<8x128xf32>
    %245 = arith.subf %237, %239 : vector<8x128xf32>
    %246 = math.exp %245 : vector<8x128xf32>
    %247 = arith.addf %244, %246 : vector<8x128xf32>
    %248 = math.log %247 : vector<8x128xf32>
    %cst = arith.constant -1.09861231 : f32
    %249 = vector.broadcast %cst : f32 to vector<8x128xf32>
    %250 = arith.addf %249, %248 : vector<8x128xf32>
    %251 = arith.addf %239, %250 : vector<8x128xf32>
    %c0_56 = arith.constant 0 : index
    %c0_57 = arith.constant 0 : index
    %252 = vector.load %arg7[%c0_56, %c0_57] : memref<8x128xf32, #tpu.memory_space<vmem>>, vector<8x128xf32>
    tpu.vector_store %arg7[%c0_56, %c0_57], %251 {strides = array<i32>} : memref<8x128xf32, #tpu.memory_space<vmem>>, vector<8x128xf32>,
    return
  }
  func.func @transform_0(%arg0: i32, %arg1: memref<16xi32, #tpu.memory_space<smem>>, %arg2: memref<16xi32, #tpu.memory_space<smem>>, %arg3: memref<16xi32, #tpu.memory_space<smem>>) -> (i32, i32) {
    %c0_i32 = arith.constant 0 : i32
    %c0_i32_0 = arith.constant 0 : i32
    %c0_i32_1 = arith.constant 0 : i32
    return %c0_i32, %c0_i32_0 : i32, i32
  }
  func.func @transform_1(%arg0: i32, %arg1: memref<16xi32, #tpu.memory_space<smem>>, %arg2: memref<16xi32, #tpu.memory_space<smem>>, %arg3: memref<16xi32, #tpu.memory_space<smem>>) -> (i32, i32) {
    %c0_i32 = arith.constant 0 : i32
    %c0_i32_0 = arith.constant 0 : i32
    %c0_i32_1 = arith.constant 0 : i32
    return %c0_i32, %c0_i32_0 : i32, i32
  }
  func.func @transform_2(%arg0: i32, %arg1: memref<16xi32, #tpu.memory_space<smem>>, %arg2: memref<16xi32, #tpu.memory_space<smem>>, %arg3: memref<16xi32, #tpu.memory_space<smem>>) -> (i32, i32) {
    %c0_i32 = arith.constant 0 : i32
    %c0_i32_0 = arith.constant 0 : i32
    %c0_i32_1 = arith.constant 0 : i32
    return %c0_i32, %c0_i32_0 : i32, i32
  }
  func.func @transform_3(%arg0: i32, %arg1: memref<16xi32, #tpu.memory_space<smem>>, %arg2: memref<16xi32, #tpu.memory_space<smem>>, %arg3: memref<16xi32, #tpu.memory_space<smem>>) -> (i32, i32) {
    %c0_i32 = arith.constant 0 : i32
    %c0_i32_0 = arith.constant 0 : i32
    return %arg0, %c0_i32 : i32, i32
  }
}

</mosaic_0001>

<bundles_post_ra>
// kernel: ngram_forward.1
= control target key start
LH: loop header
LB: loop body
LE: loop exit
PB: predicated region body
PF: predicated region fallthrough
CT: control target
= control target key end

     0   :  { %s670_s0 = inlined_call_operand.vmem [shape: s32[16], index: 0, kind: input, shape index: {}]   ;;  %s671_s3 = inlined_call_operand.vmem [shape: f32[24,128], index: 3, kind: input, shape index: {}]   ;;  %s672_s4 = inlined_call_operand.vmem [shape: f32[264,128], index: 4, kind: input, shape index: {}]   ;;  %s673_s5 = inlined_call_operand.vmem [shape: f32[4104,128], index: 5, kind: input, shape index: {}]   ;;  %s674_s6 = inlined_call_operand.vmem [shape: f32[16,128], index: 6, kind: output, shape index: {}]   ;;  %s675_s1 = inlined_call_operand.vmem [shape: s32[16], index: 1, kind: input, shape index: {}]   ;;  %s676_s2 = inlined_call_operand.vmem [shape: s32[16], index: 2, kind: input, shape index: {}]  }
   0x1   :  { %678 = sst [smem:[#allocation11_spill]] %s674_s6  ;;  %s11_s23 = sshll.u32 %s670_s0, 4  ;;  %s12_s23 = int_to_ptr.vmem [resolvable:$true] %s11_s23 }
   0x2   :  { %s15_s26 = sshll.u32 %s675_s1, 4  ;;  %s433_s27 = scalar_lea.vmem %s12_s23, 16  ;;  %s16_s26 = int_to_ptr.vmem [resolvable:$true] %s15_s26 }
   0x3   :  { %p434_p0 = scmp.ne.s32.totalorder %s12_s23, %s433_s27  ;;  %p438_p1 = scmp.lt.s32.totalorder %s12_s23, %s12_s23 }
   0x4   :  { %p439_p2 = scmp.lt.s32.totalorder %s433_s27, %s433_s27 }
   0x6   :  { %p440_p3 = por %p439_p2, %p438_p1 }
   0x8   :  { %p441_p4 = pnand %p440_p3, %p434_p0 }
   0xa   :  { %444 = shalt.err (!%p441_p4)  }
   0xb   :  { %s479_s28 = smov [#allocation6]   ;;  %s445_s29 = scalar_lea.vmem %s16_s26, 16 }
   0xc   :  { %14 = dma.vmem_to_smem %s12_s23, 16, %s479_s28, [#allocation5] }
   0xd   :  { %p446_p5 = scmp.ne.s32.totalorder %s16_s26, %s445_s29  ;;  %p450_p6 = scmp.lt.s32.totalorder %s16_s26, %s16_s26 }
   0xe   :  { %p451_p7 = scmp.lt.s32.totalorder %s445_s29, %s445_s29 }
  0x10   :  { %p452_p8 = por %p451_p7, %p450_p6 }
  0x12   :  { %p453_p9 = pnand %p452_p8, %p446_p5 }
  0x14   :  { %456 = shalt.err (!%p453_p9)  }
  0x15   :  { %s480_s0 = smov [#allocation7]   ;;  %s19_s7 = sshll.u32 %s676_s2, 4  ;;  %s20_s7 = int_to_ptr.vmem [resolvable:$true] %s19_s7 }
  0x16   :  { %18 = dma.vmem_to_smem %s16_s26, 16, %s480_s0, [#allocation5] }
  0x17   :  { %s457_s8 = scalar_lea.vmem %s20_s7, 16  ;;  %p462_p11 = scmp.lt.s32.totalorder %s20_s7, %s20_s7 }
  0x18   :  { %p458_p10 = scmp.ne.s32.totalorder %s20_s7, %s457_s8  ;;  %p463_p12 = scmp.lt.s32.totalorder %s457_s8, %s457_s8 }
  0x1a   :  { %p464_p13 = por %p463_p12, %p462_p11 }
  0x1c   :  { %p465_p0 = pnand %p464_p13, %p458_p10 }
  0x1e   :  { %468 = shalt.err (!%p465_p0)  }
  0x1f   :  { %s481_s9 = smov [#allocation8]  }
  0x20   :  { %22 = dma.vmem_to_smem %s20_s7, 16, %s481_s9, [#allocation5] }
  0x21   :  { %473 = dma.done.wait [#allocation5], 48 }
  0x22   :  { %474 = vsyncadd [#allocation5], 4294967248 }
  0x23   :  { %24 = sfence }
  0x24   :  { %s526_s10 = smov 0  }
  0x25 LB: > { %679 = sst [smem:[#allocation10_spill]] %s477_s10  ;;  %s532_s2 = sadd.s32 4294967295, %s477_s10   ;;  %s477_s10 = sphi %s526_s10, %s30_s10  }
  0x26   : > { %p409_p1 = scmp.ge.s32.totalorder %s477_s10, 1  ;;  %p144_p2 = scmp.lt.s32.totalorder %s477_s10, 3 }
  0x28   : > { %p145_p3 = pnand %p409_p1, %p144_p2 }
  0x29   : > { %s537_s11 = sshll.u32 (!%p145_p3), %s532_s2, 3  ;;  %p162_p4 = scmp.lt.s32.totalorder (!%p145_p3), %s532_s2, 1 }
  0x2a   : > { %148 = sbr.rel (%p145_p3) target bundleno = 123 (0x7b), region = 32  ;;  %s168_s12 = sld [smem:[#allocation6 + %s537_s11]] (!%p145_p3) }
  0x2b   : > { %s172_s13 = sld [smem:[#allocation7 + %s537_s11]] (!%p145_p3)  ;;  %s542_s14 = sadd.s32 (!%p145_p3), 1, %s537_s11 }
  0x2c   : > { %s545_s15 = sadd.s32 (!%p145_p3), 2, %s537_s11  ;;  %s182_s16 = sld [smem:[#allocation6 + %s542_s14]] (!%p145_p3) }
  0x2d   : > { %s187_s17 = sld [smem:[#allocation7 + %s542_s14]] (!%p145_p3)  ;;  %s552_s20 = sadd.s32 (!%p145_p3), 3, %s537_s11 }
  0x2e   : > { %s199_s18 = sld [smem:[#allocation6 + %s545_s15]] (!%p145_p3)  ;;  %s555_s21 = sadd.s32 (!%p145_p3), 4, %s537_s11 }
  0x2f   : > { %s204_s19 = sld [smem:[#allocation7 + %s545_s15]] (!%p145_p3)  ;;  %s583_s10 = sadd.s32 (!%p145_p3), 6, %s537_s11 }
  0x30   : > { %s216_s22 = sld [smem:[#allocation6 + %s552_s20]] (!%p145_p3)  ;;  %s169_s26 = scalar_lea.vmem (!%p145_p3), %s671_s3, %s168_s12 }
  0x31   : > { %s221_s23 = sld [smem:[#allocation7 + %s552_s20]]  ;;  %s173_s29 = scalar_lea.vmem %s672_s4, %s172_s13  ;;  %v170_v0 = vld [vmem:[%s169_s26] sm:$0x1] }
  0x32   : > { %v174_v1 = vld [vmem:[%s173_s29] sm:$0x1]  ;;  %s233_s0 = sld [smem:[#allocation6 + %s555_s21]]  ;;  %171 = vst [vmem:[#allocation2] sm:$0x1] %v170_v0  ;;  %s183_s8 = scalar_lea.vmem %s671_s3, %s182_s16 }
  0x33   : > { %s238_s1 = sld [smem:[#allocation7 + %s555_s21]]  ;;  %175 = vst [vmem:[#allocation3] sm:$0x1] %v174_v1  ;;  %s188_s12 = scalar_lea.vmem %s672_s4, %s187_s17  ;;  %v184_v2 = vld [vmem:[%s183_s8] sm:$0x1] }
  0x34   : > { %v189_v3 = vld [vmem:[%s188_s12] sm:$0x1]  ;;  %s200_s25 = scalar_lea.vmem %s671_s3, %s199_s18  ;;  %186 = vst [vmem:[#allocation2 + $0x1] sm:$0x1] %v184_v2  ;;  %s580_s29 = sadd.s32 5, %s537_s11 }
  0x35   : > { %s205_s28 = scalar_lea.vmem %s672_s4, %s204_s19  ;;  %191 = vst [vmem:[#allocation3 + $0x1] sm:$0x1] %v189_v3  ;;  %v201_v4 = vld [vmem:[%s200_s25] sm:$0x1]  ;;  %s250_s8 = sld [smem:[#allocation6 + %s580_s29]] }
  0x36   : > { %v206_v5 = vld [vmem:[%s205_s28] sm:$0x1]  ;;  %203 = vst [vmem:[#allocation2 + $0x2] sm:$0x1] %v201_v4  ;;  %s217_s18 = scalar_lea.vmem %s671_s3, %s216_s22  ;;  %s255_s9 = sld [smem:[#allocation7 + %s580_s29]] }
  0x37   : > { %208 = vst [vmem:[#allocation3 + $0x2] sm:$0x1] %v206_v5  ;;  %s222_s7 = scalar_lea.vmem %s672_s4, %s221_s23  ;;  %v218_v6 = vld [vmem:[%s217_s18] sm:$0x1]  ;;  %s267_s23 = sld [smem:[#allocation6 + %s583_s10]] }
  0x38   : > { %v223_v7 = vld [vmem:[%s222_s7] sm:$0x1]  ;;  %220 = vst [vmem:[#allocation2 + $0x3] sm:$0x1] %v218_v6  ;;  %s234_s13 = scalar_lea.vmem %s671_s3, %s233_s0  ;;  %s272_s27 = sld [smem:[#allocation7 + %s583_s10]] }
  0x39   : > { %225 = vst [vmem:[#allocation3 + $0x3] sm:$0x1] %v223_v7  ;;  %s239_s26 = scalar_lea.vmem %s672_s4, %s238_s1  ;;  %v235_v8 = vld [vmem:[%s234_s13] sm:$0x1]  ;;  %s602_s28 = sadd.s32 7, %s537_s11 }
  0x3a   : > { %v240_v9 = vld [vmem:[%s239_s26] sm:$0x1]  ;;  %237 = vst [vmem:[#allocation2 + $0x4] sm:$0x1] %v235_v8  ;;  %s176_s16 = sld [smem:[#allocation8 + %s537_s11]]  ;;  %s683_s2 = smov (!%p162_p4, %s532_s2), 1 }
  0x3b   : > { %242 = vst [vmem:[#allocation3 + $0x4] sm:$0x1] %v240_v9  ;;  %s284_s17 = sld [smem:[#allocation6 + %s602_s28]]  ;;  %s251_s7 = scalar_lea.vmem %s671_s3, %s250_s8 }
  0x3c   : > { %s289_s18 = sld [smem:[#allocation7 + %s602_s28]]  ;;  %s256_s13 = scalar_lea.vmem %s672_s4, %s255_s9  ;;  %v252_v10 = vld [vmem:[%s251_s7] sm:$0x1] }
  0x3d   : > { %s192_s0 = sld [smem:[#allocation8 + %s542_s14]]  ;;  %v257_v11 = vld [vmem:[%s256_s13] sm:$0x1]  ;;  %254 = vst [vmem:[#allocation2 + $0x5] sm:$0x1] %v252_v10  ;;  %s268_s14 = scalar_lea.vmem %s671_s3, %s267_s23 }
  0x3e   : > { %s209_s30 = sld [smem:[#allocation8 + %s545_s15]]  ;;  %259 = vst [vmem:[#allocation3 + $0x5] sm:$0x1] %v257_v11  ;;  %s273_s8 = scalar_lea.vmem %s672_s4, %s272_s27  ;;  %v269_v12 = vld [vmem:[%s268_s14] sm:$0x1] }
  0x3f   : > { %s616_s25 = sld [smem:[#allocation8 + %s552_s20]]  ;;  %v274_v13 = vld [vmem:[%s273_s8] sm:$0x1]  ;;  %271 = vst [vmem:[#allocation2 + $0x6] sm:$0x1] %v269_v12 }
  0x40   : > { %s619_s22 = sld [smem:[#allocation8 + %s555_s21]]  ;;  %s177_s1 = scalar_lea.vmem %s673_s5, %s176_s16  ;;  %276 = vst [vmem:[#allocation3 + $0x6] sm:$0x1] %v274_v13 }
  0x41   : > { %s260_s20 = sld [smem:[#allocation8 + %s580_s29]]  ;;  %s285_s12 = scalar_lea.vmem %s671_s3, %s284_s17  ;;  %v178_v14 = vld [vmem:[%s177_s1] sm:$0x1] }
  0x42   : > { %s290_s6 = scalar_lea.vmem %s672_s4, %s289_s18  ;;  %v286_v15 = vld [vmem:[%s285_s12] sm:$0x1]  ;;  %179 = vst [vmem:[#allocation4] sm:$0x1] %v178_v14  ;;  %s277_s17 = sld [smem:[#allocation8 + %s583_s10]] }
  0x43   : > { %v291_v16 = vld [vmem:[%s290_s6] sm:$0x1]  ;;  %s193_s29 = scalar_lea.vmem %s673_s5, %s192_s0  ;;  %288 = vst [vmem:[#allocation2 + $0x7] sm:$0x1] %v286_v15  ;;  %s294_s14 = sld [smem:[#allocation8 + %s602_s28]] }
  0x44   : > { %s210_s26 = scalar_lea.vmem %s673_s5, %s209_s30  ;;  %293 = vst [vmem:[#allocation3 + $0x7] sm:$0x1] %v291_v16  ;;  %v194_v17 = vld [vmem:[%s193_s29] sm:$0x1]  ;;  %s680_s6 = sld [smem:[#allocation11_spill]] }
  0x45   : > { %v211_v18 = vld [vmem:[%s210_s26] sm:$0x1]  ;;  %196 = vst [vmem:[#allocation4 + $0x1] sm:$0x1] %v194_v17  ;;  %s227_s8 = scalar_lea.vmem %s673_s5, %s616_s25 }
  0x46   : > { %213 = vst [vmem:[#allocation4 + $0x2] sm:$0x1] %v211_v18  ;;  %s244_s0 = scalar_lea.vmem %s673_s5, %s619_s22  ;;  %v228_v19 = vld [vmem:[%s227_s8] sm:$0x1]  ;;  %s410_s22 = sshll.u32 %s683_s2, 3 }
  0x47   : > { %v245_v20 = vld [vmem:[%s244_s0] sm:$0x1]  ;;  %230 = vst [vmem:[#allocation4 + $0x3] sm:$0x1] %v228_v19  ;;  %s261_s21 = scalar_lea.vmem %s673_s5, %s260_s20 }
  0x48   : > { %247 = vst [vmem:[#allocation4 + $0x4] sm:$0x1] %v245_v20  ;;  %v262_v21 = vld [vmem:[%s261_s21] sm:$0x1]  ;;  %s278_s7 = scalar_lea.vmem %s673_s5, %s277_s17 }
  0x49   : > { %264 = vst [vmem:[#allocation4 + $0x5] sm:$0x1] %v262_v21  ;;  %s295_s23 = scalar_lea.vmem %s673_s5, %s294_s14  ;;  %v279_v22 = vld [vmem:[%s278_s7] sm:$0x1] }
  0x4a   : > { %v296_v23 = vld [vmem:[%s295_s23] sm:$0x1]  ;;  %281 = vst [vmem:[#allocation4 + $0x6] sm:$0x1] %v279_v22  ;;  %s165_s27 = scalar_lea.vmem %s680_s6, %s410_s22 }
  0x4b   : > { %298 = vst [vmem:[#allocation4 + $0x7] sm:$0x1] %v296_v23  ;;  %v299_v24 = vld [vmem:[#allocation2] sm:$0xff]  ;;  %v300_v25 = vld [vmem:[#allocation3] sm:$0xff] }
  0x4c   : > { %v302_v26 = vmax.f32 %v299_v24, %v300_v25 }
  0x52   : > { %v301_v27 = vld [vmem:[#allocation4] sm:$0xff] }
  0x53   : > { %v303_v28 = vmax.f32 %v302_v26, %v301_v27 }
  0x55   : > { %v304_v29 = vsub.f32 %v299_v24, %v303_v28  ;;  %v307_v30 = vsub.f32 %v300_v25, %v303_v28  ;;  %v311_v31 = vsub.f32 %v301_v27, %v303_v28 }
  0x57   : > { %v305_v32 = vmul.f32 1.442695, %v304_v29  ;;  %v308_v33 = vmul.f32 1.442695, %v307_v30  ;;  %v312_v34 = vmul.f32 1.442695, %v311_v31 }
  0x59   : > { %425 = vpow2.f32 %v305_v32 }
  0x5a   : > { %427 = vpow2.f32 %v308_v33 }
  0x5b   : > { %429 = vpow2.f32 %v312_v34 }
  0x63   : > { %v426_v35 = vpop.eup %425 }
  0x64   : > { %v428_v36 = vpop.eup %427 }
  0x65   : > { %v310_v37 = vadd.f32 %v428_v36, %v426_v35  ;;  %v430_v38 = vpop.eup %429 }
  0x67   : > { %v314_v39 = vadd.f32 %v430_v38, %v310_v37 }
  0x69   : > { %431 = vlog2.f32 %v314_v39 }
  0x73   : > { %v432_v40 = vpop.eup %431 }
  0x74   : > { %v316_v41 = vmul.f32 0.6931472, %v432_v40 }
  0x76   : > { %v317_v42 = vadd.f32 -1.0986123, %v316_v41 }
  0x78   : > { %v318_v43 = vadd.f32 %v317_v42, %v303_v28 }
  0x7a   : > { %319 = vst [vmem:[%s165_s27] sm:$0xff] %v318_v43 }
  0x7b PF: > { %s681_s16 = sld [smem:[#allocation10_spill]] }
  0x81   : > { %s30_s10 = sadd.s32 1, %s681_s16  }
  0x82   : > { %p27_p5 = scmp.ge.s32.totalorder %s30_s10, 4  }
  0x84   :  { %29 = sbr.rel (!%p27_p5) target bundleno = 37 (0x25), region = 104 }

</bundles_post_ra>
